<compile_context>
chip_gen: v5e
topology: v5e:2x2
jax: 0.10.0
libtpu: 0.0.40
codegen_flags: <defaults>
</compile_context>

<pallas_src>
import math
from functools import partial

import numpy as np
import jax
import jax.numpy as jnp
from jax.experimental import pallas as pl
from jax.experimental.pallas import tpu as pltpu


# ----------------------------- schedule (glue, plain numpy/JAX) -----------------------------

def cosine_beta_schedule(timesteps, s=0.008):
    steps = timesteps + 1
    x = np.linspace(0, timesteps, steps, dtype=np.float64)
    alphas_cumprod = np.cos(((x / timesteps) + s) / (1 + s) * math.pi * 0.5) ** 2
    alphas_cumprod = alphas_cumprod / alphas_cumprod[0]
    betas = 1.0 - (alphas_cumprod[1:] / alphas_cumprod[:-1])
    return np.clip(betas, 0.0, 0.999)


def make_schedule(timesteps=1000, p2_loss_weight_gamma=0.0, p2_loss_weight_k=1.0):
    betas = cosine_beta_schedule(timesteps)
    alphas = 1.0 - betas
    alphas_cumprod = np.cumprod(alphas, axis=0)
    sched = dict(
        sqrt_alphas_cumprod=np.sqrt(alphas_cumprod),
        sqrt_one_minus_alphas_cumprod=np.sqrt(1.0 - alphas_cumprod),
        p2_loss_weight=(p2_loss_weight_k + alphas_cumprod / (1.0 - alphas_cumprod))
        ** (-p2_loss_weight_gamma),
    )
    return {k: jnp.asarray(v, jnp.float32) for k, v in sched.items()}


# ----------------------------- Pallas kernel -----------------------------

def diffusion_loss_kernel(B, C, inv_n,
                          coef_ref, lq_ref, noise_ref, temb_ref,
                          w1_ref, w2t_ref, b2_ref, out_ref):
    # Layout: lane axis = H*W tile (this grid step's chunk), sublane axis = channel/hidden.
    # coef_ref : (2, B) f32   per-batch q_sample coefficients (broadcast in-kernel)
    # lq/noise : (B, C, tile) f32, natural layout (no wrapper transpose, no bf16 cast)
    # temb_ref : (hidden, B) f32  per-batch time embedding column (broadcast in-kernel)
    # w1_ref   : (hidden, C) f32, w2t_ref : (hidden, C) f32 (= w2.T), b2_ref : (C, 1) f32
    total = jnp.zeros((), jnp.float32)

    for b in range(B):                                   # B tiny & static -> unrolled
        sa = coef_ref[0:1, b:b + 1]                      # sqrt(alphas_cumprod[t_b]),     (1,1)
        s1 = coef_ref[1:2, b:b + 1]                      # sqrt(1 - alphas_cumprod[t_b]), (1,1)

        lq_b = lq_ref[b] * 2.0 - 1.0                     # normalize_to_neg_one_to_one, (C, tile)
        nz_b = noise_ref[b]                              # (C, tile)
        x = sa * lq_b + s1 * nz_b                        # q_sample (VPU, f32)

        # layer 1: K=C-deep contraction as broadcast FMAs on the VPU (MXU skipped: K=4)
        h = w1_ref[:, 0:1] * x[0:1, :]
        for c in range(1, C):
            h = h + w1_ref[:, c:c + 1] * x[c:c + 1, :]
        h = jnp.maximum(h + temb_ref[:, b:b + 1], 0.0)   # (hidden, tile)

        # layer 2: per output channel, multiply + sublane reduce (XLU) — exact f32, no MXU
        rows = [jnp.sum(w2t_ref[:, c:c + 1] * h, axis=0, keepdims=True) for c in range(C)]
        model_out = jnp.concatenate(rows, axis=0) + b2_ref[...]          # (C, tile)

        # objective='pred_noise' -> target = noise; loss_type='l1'.
        # p2_loss_weight == 1 exactly (gamma == 0) so it is folded out.
        total = total + jnp.sum(jnp.abs(model_out - nz_b))

    # Lane-dense partial-sum row (unmasked 128-wide store): value at lane 0, zeros elsewhere.
    lane = jax.lax.broadcasted_iota(jnp.int32, (1, out_ref.shape[-1]), 1)
    out_ref[...] = jnp.where(lane == 0, total * inv_n, 0.0)


# ----------------------------- wrapper -----------------------------

def default_lane_tiles(hw):
    """Use 2 lane-parallel grid steps only where the chip has 2 TensorCores (v7x);
    on single-TC chips (v5e/v6e) keep grid=(1,) to avoid per-step grid overhead."""
    try:
        kind = jax.devices()[0].device_kind.lower()
    except Exception:
        kind = ""
    if "v7" in kind and hw % 256 == 0:
        return 2
    return 1


@partial(jax.jit, static_argnames=("n_lane_tiles",))
def gaussian_diffusion_loss(lq, hq, t, noise, params, sched, n_lane_tiles=1):
    # hq is only needed for objective='pred_x0' or T is not None; unused here
    # (intentionally never DMA'd into the kernel).
    del hq
    B, C, H, W = lq.shape
    HW = H * W
    hidden = params["w1"].shape[0]

    if HW % (128 * n_lane_tiles) != 0:
        n_lane_tiles = 1
    tile_hw = HW // n_lane_tiles

    hp = jax.lax.Precision.HIGHEST

    # Tiny per-batch glue (nothing here scales with H*W; fused by XLA under jit):
    # schedule gather -> (2, B) coefficients, sinusoidal time embedding -> (hidden, B).
    # TODO(synk): could also be folded fully in-kernel via scalar-prefetched t + SMEM
    # schedule tables; kept in the jitted wrapper since it is a few hundred bytes.
    sa = sched["sqrt_alphas_cumprod"][t]
    s1 = sched["sqrt_one_minus_alphas_cumprod"][t]
    coefs = jnp.stack([sa, s1], axis=0).astype(jnp.float32)               # (2, B)

    half = hidden // 2
    freqs = jnp.exp(-math.log(10000.0) * jnp.arange(half, dtype=jnp.float32) / (half - 1))
    ang = t.astype(jnp.float32)[:, None] * freqs[None, :]
    sin_emb = jnp.concatenate([jnp.sin(ang), jnp.cos(ang)], axis=-1)      # (B, hidden)
    temb = (jnp.matmul(sin_emb, params["wt"], precision=hp)
            + params["bt"] + params["b1"]).T.astype(jnp.float32)          # (hidden, B)

    # Natural layout, f32, reshape only (no materializing transpose, no bf16 casts).
    lq3 = lq.reshape(B, C, HW)
    nz3 = noise.reshape(B, C, HW)
    w2t = params["w2"].T                                                   # (hidden, C), tiny

    inv_n = 1.0 / float(B * C * HW)

    out_row = pl.pallas_call(
        partial(diffusion_loss_kernel, B, C, inv_n),
        out_shape=jax.ShapeDtypeStruct((1, n_lane_tiles * 128), jnp.float32),
        grid=(n_lane_tiles,),
        in_specs=[
            pl.BlockSpec((2, B), lambda i: (0, 0)),               # q_sample coefficients
            pl.BlockSpec((B, C, tile_hw), lambda i: (0, 0, i)),   # lq   (f32)
            pl.BlockSpec((B, C, tile_hw), lambda i: (0, 0, i)),   # noise (f32)
            pl.BlockSpec((hidden, B), lambda i: (0, 0)),          # time embedding (tiny)
            pl.BlockSpec((hidden, C), lambda i: (0, 0)),          # w1
            pl.BlockSpec((hidden, C), lambda i: (0, 0)),          # w2^T
            pl.BlockSpec((C, 1), lambda i: (0, 0)),               # b2 (4 floats)
        ],
        out_specs=pl.BlockSpec((1, 128), lambda i: (0, i)),       # lane-dense partial sums
        compiler_params=pltpu.CompilerParams(dimension_semantics=("parallel",)),
    )(coefs, lq3, nz3, temb, params["w1"], w2t, params["b2"])

    return jnp.sum(out_row)   # partials already scaled by 1/N; zeros elsewhere


# ----------------------------- pure-JAX reference (for checking, f32) -----------------------------

def reference_loss(lq, hq, t, noise, params, sched):
    B, C, H, W = lq.shape
    hidden = params["w1"].shape[0]
    hp = jax.lax.Precision.HIGHEST
    lq_n = lq * 2.0 - 1.0
    sa = sched["sqrt_alphas_cumprod"][t][:, None, None, None]
    s1 = sched["sqrt_one_minus_alphas_cumprod"][t][:, None, None, None]
    x = sa * lq_n + s1 * noise
    half = hidden // 2
    freqs = jnp.exp(-math.log(10000.0) * jnp.arange(half, dtype=jnp.float32) / (half - 1))
    ang = t.astype(jnp.float32)[:, None] * freqs[None, :]
    sin_emb = jnp.concatenate([jnp.sin(ang), jnp.cos(ang)], axis=-1)
    temb = jnp.matmul(sin_emb, params["wt"], precision=hp) + params["bt"] + params["b1"]
    xf = x.reshape(B, C, H * W)
    h = jnp.einsum("hc,bcp->bhp", params["w1"], xf, precision=hp) + temb[:, :, None]
    h = jnp.maximum(h, 0.0)
    out = jnp.einsum("ch,bhp->bcp", params["w2"], h, precision=hp) + params["b2"][None]
    loss = jnp.abs(out - noise.reshape(B, C, H * W))
    p2 = sched["p2_loss_weight"][t][:, None, None]
    return jnp.mean(loss * p2)


# ----------------------------- main -----------------------------

if __name__ == "__main__":
    B, C, H, W = 2, 4, 16, 16
    hidden = 32
    timesteps = 1000

    key = jax.random.PRNGKey(0)
    k = jax.random.split(key, 10)
    lq = jax.random.uniform(k[0], (B, C, H, W), jnp.float32)   # images in [0, 1]
    hq = jax.random.uniform(k[1], (B, C, H, W), jnp.float32)
    t = jax.random.randint(k[2], (B,), 0, timesteps)           # t ~ U[time_bound)
    noise = jax.random.normal(k[3], (B, C, H, W), jnp.float32)

    params = dict(
        w1=0.1 * jax.random.normal(k[4], (hidden, C), jnp.float32),
        b1=0.1 * jax.random.normal(k[5], (hidden,), jnp.float32),
        w2=0.1 * jax.random.normal(k[6], (C, hidden), jnp.float32),
        b2=0.1 * jax.random.normal(k[7], (C, 1), jnp.float32),
        wt=0.1 * jax.random.normal(k[8], (hidden, hidden), jnp.float32),
        bt=0.1 * jax.random.normal(k[9], (hidden,), jnp.float32),
    )
    sched = make_schedule(timesteps)

    # TODO(synk): the original module wraps an arbitrary external U-Net; here the denoiser
    # is a synthetic time-conditioned channel-mixing MLP so the hot path stays in-kernel.

    n_tiles = default_lane_tiles(H * W)

    loss = jax.block_until_ready(
        gaussian_diffusion_loss(lq, hq, t, noise, params, sched, n_lane_tiles=n_tiles))
    ref = reference_loss(lq, hq, t, noise, params, sched)
    # f32 end-to-end (no bf16 target quantization) -> much tighter tolerance than before
    assert jnp.allclose(loss, ref, rtol=1e-3, atol=1e-3), (float(loss), float(ref))
    print("KERNEL_OK")
</pallas_src>

<mosaic_0001>
module attributes {stable_mosaic.version = 11 : i64} {
  func.func @diffusion_loss_kernel(%arg0: i32, %arg1: memref<2x2xf32, #tpu.memory_space<vmem>>, %arg2: memref<2x4x256xf32, #tpu.memory_space<vmem>>, %arg3: memref<2x4x256xf32, #tpu.memory_space<vmem>>, %arg4: memref<32x2xf32, #tpu.memory_space<vmem>>, %arg5: memref<32x4xf32, #tpu.memory_space<vmem>>, %arg6: memref<32x4xf32, #tpu.memory_space<vmem>>, %arg7: memref<4x1xf32, #tpu.memory_space<vmem>>, %arg8: memref<1x128xf32, #tpu.memory_space<vmem>>) attributes {dimension_semantics = [#tpu.dimension_semantics<parallel>], iteration_bounds = array<i64: 1>, scalar_prefetch = 0 : i64, scratch_operands = 0 : i64, tpu.core_type = #tpu.core_type<tc>, window_params = [{pipeline_mode = #tpu.pipeline_mode<synchronous>, transform_indices = @transform_0, window_bounds = array<i64: 2, 2>}, {transform_indices = @transform_1, window_bounds = array<i64: 2, 4, 256>}, {transform_indices = @transform_2, window_bounds = array<i64: 2, 4, 256>}, {pipeline_mode = #tpu.pipeline_mode<synchronous>, transform_indices = @transform_3, window_bounds = array<i64: 32, 2>}, {pipeline_mode = #tpu.pipeline_mode<synchronous>, transform_indices = @transform_4, window_bounds = array<i64: 32, 4>}, {pipeline_mode = #tpu.pipeline_mode<synchronous>, transform_indices = @transform_5, window_bounds = array<i64: 32, 4>}, {pipeline_mode = #tpu.pipeline_mode<synchronous>, transform_indices = @transform_6, window_bounds = array<i64: 4, 1>}, {transform_indices = @transform_7, window_bounds = array<i64: 1, 128>}]} {
    %c0 = arith.constant 0 : index
    %c0_0 = arith.constant 0 : index
    %0 = vector.load %arg1[%c0, %c0_0] : memref<2x2xf32, #tpu.memory_space<vmem>>, vector<1x1xf32>
    %c1 = arith.constant 1 : index
    %c0_1 = arith.constant 0 : index
    %1 = vector.load %arg1[%c1, %c0_1] : memref<2x2xf32, #tpu.memory_space<vmem>>, vector<1x1xf32>
    %c0_2 = arith.constant 0 : index
    %c0_3 = arith.constant 0 : index
    %c0_4 = arith.constant 0 : index
    %2 = vector.load %arg2[%c0_2, %c0_3, %c0_4] : memref<2x4x256xf32, #tpu.memory_space<vmem>>, vector<1x4x256xf32>
    %3 = vector.shape_cast %2 : vector<1x4x256xf32> to vector<4x256xf32>
    %cst = arith.constant 2.000000e+00 : f32
    %4 = vector.broadcast %cst : f32 to vector<4x256xf32>
    %5 = arith.mulf %3, %4 : vector<4x256xf32>
    %cst_5 = arith.constant 1.000000e+00 : f32
    %6 = vector.broadcast %cst_5 : f32 to vector<4x256xf32>
    %7 = arith.subf %5, %6 : vector<4x256xf32>
    %c0_6 = arith.constant 0 : index
    %c0_7 = arith.constant 0 : index
    %c0_8 = arith.constant 0 : index
    %8 = vector.load %arg3[%c0_6, %c0_7, %c0_8] : memref<2x4x256xf32, #tpu.memory_space<vmem>>, vector<1x4x256xf32>
    %9 = vector.shape_cast %8 : vector<1x4x256xf32> to vector<4x256xf32>
    %10 = vector.broadcast %0 : vector<1x1xf32> to vector<4x256xf32>
    %11 = arith.mulf %10, %7 : vector<4x256xf32>
    %12 = vector.broadcast %1 : vector<1x1xf32> to vector<4x256xf32>
    %13 = arith.mulf %12, %9 : vector<4x256xf32>
    %14 = arith.addf %11, %13 : vector<4x256xf32>
    %c0_9 = arith.constant 0 : index
    %c0_10 = arith.constant 0 : index
    %15 = vector.load %arg5[%c0_9, %c0_10] : memref<32x4xf32, #tpu.memory_space<vmem>>, vector<32x1xf32>
    %16 = vector.extract_strided_slice %14 {offsets = [0, 0], sizes = [1, 256], strides = [1, 1]} : vector<4x256xf32> to vector<1x256xf32>
    %17 = vector.broadcast %15 : vector<32x1xf32> to vector<32x256xf32>
    %18 = vector.broadcast %16 : vector<1x256xf32> to vector<32x256xf32>
    %19 = arith.mulf %17, %18 : vector<32x256xf32>
    %c0_11 = arith.constant 0 : index
    %c1_12 = arith.constant 1 : index
    %20 = vector.load %arg5[%c0_11, %c1_12] : memref<32x4xf32, #tpu.memory_space<vmem>>, vector<32x1xf32>
    %21 = vector.extract_strided_slice %14 {offsets = [1, 0], sizes = [1, 256], strides = [1, 1]} : vector<4x256xf32> to vector<1x256xf32>
    %22 = vector.broadcast %20 : vector<32x1xf32> to vector<32x256xf32>
    %23 = vector.broadcast %21 : vector<1x256xf32> to vector<32x256xf32>
    %24 = arith.mulf %22, %23 : vector<32x256xf32>
    %25 = arith.addf %19, %24 : vector<32x256xf32>
    %c0_13 = arith.constant 0 : index
    %c2 = arith.constant 2 : index
    %26 = vector.load %arg5[%c0_13, %c2] : memref<32x4xf32, #tpu.memory_space<vmem>>, vector<32x1xf32>
    %27 = vector.extract_strided_slice %14 {offsets = [2, 0], sizes = [1, 256], strides = [1, 1]} : vector<4x256xf32> to vector<1x256xf32>
    %28 = vector.broadcast %26 : vector<32x1xf32> to vector<32x256xf32>
    %29 = vector.broadcast %27 : vector<1x256xf32> to vector<32x256xf32>
    %30 = arith.mulf %28, %29 : vector<32x256xf32>
    %31 = arith.addf %25, %30 : vector<32x256xf32>
    %c0_14 = arith.constant 0 : index
    %c3 = arith.constant 3 : index
    %32 = vector.load %arg5[%c0_14, %c3] : memref<32x4xf32, #tpu.memory_space<vmem>>, vector<32x1xf32>
    %33 = vector.extract_strided_slice %14 {offsets = [3, 0], sizes = [1, 256], strides = [1, 1]} : vector<4x256xf32> to vector<1x256xf32>
    %34 = vector.broadcast %32 : vector<32x1xf32> to vector<32x256xf32>
    %35 = vector.broadcast %33 : vector<1x256xf32> to vector<32x256xf32>
    %36 = arith.mulf %34, %35 : vector<32x256xf32>
    %37 = arith.addf %31, %36 : vector<32x256xf32>
    %c0_15 = arith.constant 0 : index
    %c0_16 = arith.constant 0 : index
    %38 = vector.load %arg4[%c0_15, %c0_16] : memref<32x2xf32, #tpu.memory_space<vmem>>, vector<32x1xf32>
    %39 = vector.broadcast %38 : vector<32x1xf32> to vector<32x256xf32>
    %40 = arith.addf %37, %39 : vector<32x256xf32>
    %cst_17 = arith.constant 0.000000e+00 : f32
    %41 = vector.broadcast %cst_17 : f32 to vector<32x256xf32>
    %42 = arith.maximumf %40, %41 : vector<32x256xf32>
    %c0_18 = arith.constant 0 : index
    %c0_19 = arith.constant 0 : index
    %43 = vector.load %arg6[%c0_18, %c0_19] : memref<32x4xf32, #tpu.memory_space<vmem>>, vector<32x1xf32>
    %44 = vector.broadcast %43 : vector<32x1xf32> to vector<32x256xf32>
    %45 = arith.mulf %44, %42 : vector<32x256xf32>
    %cst_20 = arith.constant dense<0.000000e+00> : vector<256xf32>
    %46 = vector.multi_reduction <add>, %45, %cst_20 [0] : vector<32x256xf32> to vector<256xf32>
    %47 = vector.shape_cast %46 : vector<256xf32> to vector<1x256xf32>
    %c0_21 = arith.constant 0 : index
    %c1_22 = arith.constant 1 : index
    %48 = vector.load %arg6[%c0_21, %c1_22] : memref<32x4xf32, #tpu.memory_space<vmem>>, vector<32x1xf32>
    %49 = vector.broadcast %48 : vector<32x1xf32> to vector<32x256xf32>
    %50 = arith.mulf %49, %42 : vector<32x256xf32>
    %cst_23 = arith.constant dense<0.000000e+00> : vector<256xf32>
    %51 = vector.multi_reduction <add>, %50, %cst_23 [0] : vector<32x256xf32> to vector<256xf32>
    %52 = vector.shape_cast %51 : vector<256xf32> to vector<1x256xf32>
    %c0_24 = arith.constant 0 : index
    %c2_25 = arith.constant 2 : index
    %53 = vector.load %arg6[%c0_24, %c2_25] : memref<32x4xf32, #tpu.memory_space<vmem>>, vector<32x1xf32>
    %54 = vector.broadcast %53 : vector<32x1xf32> to vector<32x256xf32>
    %55 = arith.mulf %54, %42 : vector<32x256xf32>
    %cst_26 = arith.constant dense<0.000000e+00> : vector<256xf32>
    %56 = vector.multi_reduction <add>, %55, %cst_26 [0] : vector<32x256xf32> to vector<256xf32>
    %57 = vector.shape_cast %56 : vector<256xf32> to vector<1x256xf32>
    %c0_27 = arith.constant 0 : index
    %c3_28 = arith.constant 3 : index
    %58 = vector.load %arg6[%c0_27, %c3_28] : memref<32x4xf32, #tpu.memory_space<vmem>>, vector<32x1xf32>
    %59 = vector.broadcast %58 : vector<32x1xf32> to vector<32x256xf32>
    %60 = arith.mulf %59, %42 : vector<32x256xf32>
    %cst_29 = arith.constant dense<0.000000e+00> : vector<256xf32>
    %61 = vector.multi_reduction <add>, %60, %cst_29 [0] : vector<32x256xf32> to vector<256xf32>
    %62 = vector.shape_cast %61 : vector<256xf32> to vector<1x256xf32>
    %63 = tpu.concatenate %47, %52, %57, %62 in 0 : vector<1x256xf32>, vector<1x256xf32>, vector<1x256xf32>, vector<1x256xf32> -> vector<4x256xf32>
    %c0_30 = arith.constant 0 : index
    %c0_31 = arith.constant 0 : index
    %64 = vector.load %arg7[%c0_30, %c0_31] : memref<4x1xf32, #tpu.memory_space<vmem>>, vector<4x1xf32>
    %65 = vector.broadcast %64 : vector<4x1xf32> to vector<4x256xf32>
    %66 = arith.addf %63, %65 : vector<4x256xf32>
    %67 = arith.subf %66, %9 : vector<4x256xf32>
    %68 = math.absf %67 : vector<4x256xf32>
    %69 = vector.shape_cast %68 : vector<4x256xf32> to vector<1x4x256xf32>
    %cst_32 = arith.constant dense<0.000000e+00> : vector<1xf32>
    %70 = vector.multi_reduction <add>, %69, %cst_32 [1, 2] : vector<1x4x256xf32> to vector<1xf32>
    %71 = vector.shape_cast %70 : vector<1xf32> to vector<1x1x1xf32>
    %72 = vector.extract %71[0, 0, 0] : f32 from vector<1x1x1xf32>
    %cst_33 = arith.constant 0.000000e+00 : f32
    %73 = arith.addf %cst_33, %72 : f32
    %c0_34 = arith.constant 0 : index
    %c1_35 = arith.constant 1 : index
    %74 = vector.load %arg1[%c0_34, %c1_35] : memref<2x2xf32, #tpu.memory_space<vmem>>, vector<1x1xf32>
    %c1_36 = arith.constant 1 : index
    %c1_37 = arith.constant 1 : index
    %75 = vector.load %arg1[%c1_36, %c1_37] : memref<2x2xf32, #tpu.memory_space<vmem>>, vector<1x1xf32>
    %c1_38 = arith.constant 1 : index
    %c0_39 = arith.constant 0 : index
    %c0_40 = arith.constant 0 : index
    %76 = vector.load %arg2[%c1_38, %c0_39, %c0_40] : memref<2x4x256xf32, #tpu.memory_space<vmem>>, vector<1x4x256xf32>
    %77 = vector.shape_cast %76 : vector<1x4x256xf32> to vector<4x256xf32>
    %cst_41 = arith.constant 2.000000e+00 : f32
    %78 = vector.broadcast %cst_41 : f32 to vector<4x256xf32>
    %79 = arith.mulf %77, %78 : vector<4x256xf32>
    %cst_42 = arith.constant 1.000000e+00 : f32
    %80 = vector.broadcast %cst_42 : f32 to vector<4x256xf32>
    %81 = arith.subf %79, %80 : vector<4x256xf32>
    %c1_43 = arith.constant 1 : index
    %c0_44 = arith.constant 0 : index
    %c0_45 = arith.constant 0 : index
    %82 = vector.load %arg3[%c1_43, %c0_44, %c0_45] : memref<2x4x256xf32, #tpu.memory_space<vmem>>, vector<1x4x256xf32>
    %83 = vector.shape_cast %82 : vector<1x4x256xf32> to vector<4x256xf32>
    %84 = vector.broadcast %74 : vector<1x1xf32> to vector<4x256xf32>
    %85 = arith.mulf %84, %81 : vector<4x256xf32>
    %86 = vector.broadcast %75 : vector<1x1xf32> to vector<4x256xf32>
    %87 = arith.mulf %86, %83 : vector<4x256xf32>
    %88 = arith.addf %85, %87 : vector<4x256xf32>
    %c0_46 = arith.constant 0 : index
    %c0_47 = arith.constant 0 : index
    %89 = vector.load %arg5[%c0_46, %c0_47] : memref<32x4xf32, #tpu.memory_space<vmem>>, vector<32x1xf32>
    %90 = vector.extract_strided_slice %88 {offsets = [0, 0], sizes = [1, 256], strides = [1, 1]} : vector<4x256xf32> to vector<1x256xf32>
    %91 = vector.broadcast %89 : vector<32x1xf32> to vector<32x256xf32>
    %92 = vector.broadcast %90 : vector<1x256xf32> to vector<32x256xf32>
    %93 = arith.mulf %91, %92 : vector<32x256xf32>
    %c0_48 = arith.constant 0 : index
    %c1_49 = arith.constant 1 : index
    %94 = vector.load %arg5[%c0_48, %c1_49] : memref<32x4xf32, #tpu.memory_space<vmem>>, vector<32x1xf32>
    %95 = vector.extract_strided_slice %88 {offsets = [1, 0], sizes = [1, 256], strides = [1, 1]} : vector<4x256xf32> to vector<1x256xf32>
    %96 = vector.broadcast %94 : vector<32x1xf32> to vector<32x256xf32>
    %97 = vector.broadcast %95 : vector<1x256xf32> to vector<32x256xf32>
    %98 = arith.mulf %96, %97 : vector<32x256xf32>
    %99 = arith.addf %93, %98 : vector<32x256xf32>
    %c0_50 = arith.constant 0 : index
    %c2_51 = arith.constant 2 : index
    %100 = vector.load %arg5[%c0_50, %c2_51] : memref<32x4xf32, #tpu.memory_space<vmem>>, vector<32x1xf32>
    %101 = vector.extract_strided_slice %88 {offsets = [2, 0], sizes = [1, 256], strides = [1, 1]} : vector<4x256xf32> to vector<1x256xf32>
    %102 = vector.broadcast %100 : vector<32x1xf32> to vector<32x256xf32>
    %103 = vector.broadcast %101 : vector<1x256xf32> to vector<32x256xf32>
    %104 = arith.mulf %102, %103 : vector<32x256xf32>
    %105 = arith.addf %99, %104 : vector<32x256xf32>
    %c0_52 = arith.constant 0 : index
    %c3_53 = arith.constant 3 : index
    %106 = vector.load %arg5[%c0_52, %c3_53] : memref<32x4xf32, #tpu.memory_space<vmem>>, vector<32x1xf32>
    %107 = vector.extract_strided_slice %88 {offsets = [3, 0], sizes = [1, 256], strides = [1, 1]} : vector<4x256xf32> to vector<1x256xf32>
    %108 = vector.broadcast %106 : vector<32x1xf32> to vector<32x256xf32>
    %109 = vector.broadcast %107 : vector<1x256xf32> to vector<32x256xf32>
    %110 = arith.mulf %108, %109 : vector<32x256xf32>
    %111 = arith.addf %105, %110 : vector<32x256xf32>
    %c0_54 = arith.constant 0 : index
    %c1_55 = arith.constant 1 : index
    %112 = vector.load %arg4[%c0_54, %c1_55] : memref<32x2xf32, #tpu.memory_space<vmem>>, vector<32x1xf32>
    %113 = vector.broadcast %112 : vector<32x1xf32> to vector<32x256xf32>
    %114 = arith.addf %111, %113 : vector<32x256xf32>
    %cst_56 = arith.constant 0.000000e+00 : f32
    %115 = vector.broadcast %cst_56 : f32 to vector<32x256xf32>
    %116 = arith.maximumf %114, %115 : vector<32x256xf32>
    %c0_57 = arith.constant 0 : index
    %c0_58 = arith.constant 0 : index
    %117 = vector.load %arg6[%c0_57, %c0_58] : memref<32x4xf32, #tpu.memory_space<vmem>>, vector<32x1xf32>
    %118 = vector.broadcast %117 : vector<32x1xf32> to vector<32x256xf32>
    %119 = arith.mulf %118, %116 : vector<32x256xf32>
    %cst_59 = arith.constant dense<0.000000e+00> : vector<256xf32>
    %120 = vector.multi_reduction <add>, %119, %cst_59 [0] : vector<32x256xf32> to vector<256xf32>
    %121 = vector.shape_cast %120 : vector<256xf32> to vector<1x256xf32>
    %c0_60 = arith.constant 0 : index
    %c1_61 = arith.constant 1 : index
    %122 = vector.load %arg6[%c0_60, %c1_61] : memref<32x4xf32, #tpu.memory_space<vmem>>, vector<32x1xf32>
    %123 = vector.broadcast %122 : vector<32x1xf32> to vector<32x256xf32>
    %124 = arith.mulf %123, %116 : vector<32x256xf32>
    %cst_62 = arith.constant dense<0.000000e+00> : vector<256xf32>
    %125 = vector.multi_reduction <add>, %124, %cst_62 [0] : vector<32x256xf32> to vector<256xf32>
    %126 = vector.shape_cast %125 : vector<256xf32> to vector<1x256xf32>
    %c0_63 = arith.constant 0 : index
    %c2_64 = arith.constant 2 : index
    %127 = vector.load %arg6[%c0_63, %c2_64] : memref<32x4xf32, #tpu.memory_space<vmem>>, vector<32x1xf32>
    %128 = vector.broadcast %127 : vector<32x1xf32> to vector<32x256xf32>
    %129 = arith.mulf %128, %116 : vector<32x256xf32>
    %cst_65 = arith.constant dense<0.000000e+00> : vector<256xf32>
    %130 = vector.multi_reduction <add>, %129, %cst_65 [0] : vector<32x256xf32> to vector<256xf32>
    %131 = vector.shape_cast %130 : vector<256xf32> to vector<1x256xf32>
    %c0_66 = arith.constant 0 : index
    %c3_67 = arith.constant 3 : index
    %132 = vector.load %arg6[%c0_66, %c3_67] : memref<32x4xf32, #tpu.memory_space<vmem>>, vector<32x1xf32>
    %133 = vector.broadcast %132 : vector<32x1xf32> to vector<32x256xf32>
    %134 = arith.mulf %133, %116 : vector<32x256xf32>
    %cst_68 = arith.constant dense<0.000000e+00> : vector<256xf32>
    %135 = vector.multi_reduction <add>, %134, %cst_68 [0] : vector<32x256xf32> to vector<256xf32>
    %136 = vector.shape_cast %135 : vector<256xf32> to vector<1x256xf32>
    %137 = tpu.concatenate %121, %126, %131, %136 in 0 : vector<1x256xf32>, vector<1x256xf32>, vector<1x256xf32>, vector<1x256xf32> -> vector<4x256xf32>
    %c0_69 = arith.constant 0 : index
    %c0_70 = arith.constant 0 : index
    %138 = vector.load %arg7[%c0_69, %c0_70] : memref<4x1xf32, #tpu.memory_space<vmem>>, vector<4x1xf32>
    %139 = vector.broadcast %138 : vector<4x1xf32> to vector<4x256xf32>
    %140 = arith.addf %137, %139 : vector<4x256xf32>
    %141 = arith.subf %140, %83 : vector<4x256xf32>
    %142 = math.absf %141 : vector<4x256xf32>
    %143 = vector.shape_cast %142 : vector<4x256xf32> to vector<1x4x256xf32>
    %cst_71 = arith.constant dense<0.000000e+00> : vector<1xf32>
    %144 = vector.multi_reduction <add>, %143, %cst_71 [1, 2] : vector<1x4x256xf32> to vector<1xf32>
    %145 = vector.shape_cast %144 : vector<1xf32> to vector<1x1x1xf32>
    %146 = vector.extract %145[0, 0, 0] : f32 from vector<1x1x1xf32>
    %147 = arith.addf %73, %146 : f32
    %148 = tpu.iota {dimensions = array<i32: 1>} : vector<1x128xi32>
    %c0_i32 = arith.constant 0 : i32
    %149 = vector.broadcast %c0_i32 : i32 to vector<1x128xi32>
    %150 = arith.cmpi eq, %148, %149 : vector<1x128xi32>
    %cst_72 = arith.constant 4.8828125E-4 : f32
    %151 = arith.mulf %147, %cst_72 : f32
    %cst_73 = arith.constant 0.000000e+00 : f32
    %152 = vector.broadcast %151 : f32 to vector<1x128xf32>
    %153 = vector.broadcast %cst_73 : f32 to vector<1x128xf32>
    %154 = arith.select %150, %152, %153 : vector<1x128xi1>, vector<1x128xf32>
    %c0_74 = arith.constant 0 : index
    %c0_75 = arith.constant 0 : index
    %155 = vector.load %arg8[%c0_74, %c0_75] : memref<1x128xf32, #tpu.memory_space<vmem>>, vector<1x128xf32>
    tpu.vector_store %arg8[%c0_74, %c0_75], %154 {strides = array<i32>} : memref<1x128xf32, #tpu.memory_space<vmem>>, vector<1x128xf32>,
    return
  }
  func.func @transform_0(%arg0: i32) -> (i32, i32) {
    %c0_i32 = arith.constant 0 : i32
    %c0_i32_0 = arith.constant 0 : i32
    %c0_i32_1 = arith.constant 0 : i32
    return %c0_i32, %c0_i32_0 : i32, i32
  }
  func.func @transform_1(%arg0: i32) -> (i32, i32, i32) {
    %c0_i32 = arith.constant 0 : i32
    %c0_i32_0 = arith.constant 0 : i32
    %c0_i32_1 = arith.constant 0 : i32
    return %c0_i32, %c0_i32_0, %arg0 : i32, i32, i32
  }
  func.func @transform_2(%arg0: i32) -> (i32, i32, i32) {
    %c0_i32 = arith.constant 0 : i32
    %c0_i32_0 = arith.constant 0 : i32
    %c0_i32_1 = arith.constant 0 : i32
    return %c0_i32, %c0_i32_0, %arg0 : i32, i32, i32
  }
  func.func @transform_3(%arg0: i32) -> (i32, i32) {
    %c0_i32 = arith.constant 0 : i32
    %c0_i32_0 = arith.constant 0 : i32
    %c0_i32_1 = arith.constant 0 : i32
    return %c0_i32, %c0_i32_0 : i32, i32
  }
  func.func @transform_4(%arg0: i32) -> (i32, i32) {
    %c0_i32 = arith.constant 0 : i32
    %c0_i32_0 = arith.constant 0 : i32
    %c0_i32_1 = arith.constant 0 : i32
    return %c0_i32, %c0_i32_0 : i32, i32
  }
  func.func @transform_5(%arg0: i32) -> (i32, i32) {
    %c0_i32 = arith.constant 0 : i32
    %c0_i32_0 = arith.constant 0 : i32
    %c0_i32_1 = arith.constant 0 : i32
    return %c0_i32, %c0_i32_0 : i32, i32
  }
  func.func @transform_6(%arg0: i32) -> (i32, i32) {
    %c0_i32 = arith.constant 0 : i32
    %c0_i32_0 = arith.constant 0 : i32
    %c0_i32_1 = arith.constant 0 : i32
    return %c0_i32, %c0_i32_0 : i32, i32
  }
  func.func @transform_7(%arg0: i32) -> (i32, i32) {
    %c0_i32 = arith.constant 0 : i32
    %c0_i32_0 = arith.constant 0 : i32
    return %c0_i32, %arg0 : i32, i32
  }
}

</mosaic_0001>

<bundles_post_ra>
// kernel: gaussian_diffusion_loss.1
= control target key start
LH: loop header
LB: loop body
LE: loop exit
PB: predicated region body
PF: predicated region fallthrough
CT: control target
= control target key end

     0   :  { %v792_v0 = vmov 1   ;;  %v793_v1 = vmov 0   ;;  %v794_v7 = vmov 2   ;;  %v795_v11 = vmov 3   ;;  %s796_s14 = smov 127   ;;  %s1221_s4 = inlined_call_operand.vmem [shape: f32[32,4], index: 4, kind: input, shape index: {}]   ;;  %s1222_s3 = inlined_call_operand.vmem [shape: f32[32,2], index: 3, kind: input, shape index: {}]   ;;  %s1223_s5 = inlined_call_operand.vmem [shape: f32[32,4], index: 5, kind: input, shape index: {}]   ;;  %s1224_s0 = inlined_call_operand.vmem [shape: f32[2,2], index: 0, kind: input, shape index: {}]   ;;  %s1225_s2 = inlined_call_operand.vmem [shape: f32[2,4,256], index: 2, kind: input, shape index: {}]   ;;  %s1226_s6 = inlined_call_operand.vmem [shape: f32[4,1], index: 6, kind: input, shape index: {}]   ;;  %s1227_s1 = inlined_call_operand.vmem [shape: f32[2,4,256], index: 1, kind: input, shape index: {}]   ;;  %s1228_s7 = inlined_call_operand.vmem [shape: f32[1,128], index: 7, kind: output, shape index: {}]  }
   0x1   :  { %765 = vset.pattern.permute.xlu1 %v792_v0  ;;  %766 = vset.pattern.permute.xlu2 %v793_v1  ;;  %v45_v2 = vld [vmem:[%s1221_s4 + $0x10] sm:$0xff]  ;;  %v43_v3 = vld [vmem:[%s1221_s4] sm:$0xff]  ;;  %v44_v4 = vld [vmem:[%s1221_s4 + $0x8] sm:$0xff]  ;;  %vm412_vm0 = vcmask 1040384   ;;  %vm415_vm1 = vcmask 1041408   ;;  %vm418_vm2 = vcmask 1042432  }
   0x2   :  { %764 = vset.pattern.permute.xlu0 %v793_v1  ;;  %59 = vperm.xlu2 %766, %v45_v2   ;;  %v853_v5 = vld [vmem:[%s1222_s3] sm:$0xff]  ;;  %v46_v6 = vld [vmem:[%s1221_s4 + $0x18] sm:$0xff]  ;;  %v237_v8 = vld [vmem:[%s1223_s5 + $0x8] sm:$0xff]  ;;  %vm439_vm3 = vcmask 1043456  }
   0x3   :  { %83 = vperm.xlu1 %765, %v43_v3   ;;  %49 = vperm.xlu0 %764, %v43_v3   ;;  %v26_v9 = vld [vmem:[%s1224_s0] sm:$0x1]  ;;  %v27_v10 = vld [vmem:[%s1224_s0 + $0x1] sm:$0x1]  ;;  %v873_v12 = vld [vmem:[%s1222_s3 + $0x8] sm:$0xff] }
   0x4   :  { %747 = vpush %v26_v9  ;;  %v878_v13 = vld [vmem:[%s1222_s3 + $0x10] sm:$0xff]  ;;  %v236_v14 = vld [vmem:[%s1223_s5] sm:$0xff]  ;;  %v890_v15 = vld [vmem:[%s1222_s3 + $0x18] sm:$0xff] }
   0x5   :  { %749 = vpush %v27_v10  ;;  %v239_v16 = vld [vmem:[%s1223_s5 + $0x18] sm:$0xff]  ;;  %v31_v17 = vld [vmem:[%s1225_s2] sm:$0xff]  ;;  %v238_v18 = vld [vmem:[%s1223_s5 + $0x10] sm:$0xff] }
   0x6   :  { %430 = vst [vmem:[#allocation1] ss:$2 sm:$0xff] %v31_v17  ;;  %v421_v23 = vld [vmem:[%s1226_s6] sm:$0xf] }
   0x7   :  { %v28_v35 = vld [vmem:[%s1227_s1] sm:$0xff] }
   0x8   :  { %v29_v38 = vmul.f32 2.0, %v28_v35 }
   0xa   :  { %767 = vset.pattern.permute.xlu2 %v792_v0  ;;  %v743_v40 = vadd.f32 -1.0, %v29_v38 }
   0xb   :  { %87 = vperm.xlu1 %765, %v44_v4   ;;  %54 = vperm.xlu0 %764, %v44_v4  }
   0xc   :  { %91 = vperm.xlu2 %767, %v45_v2  }
  0x13   :  { %768 = vset.pattern.permute.xlu1 %v794_v7  ;;  %202 = vperm.xlu0 %764, %v853_v5  }
  0x14   :  { %769 = vset.pattern.permute.xlu2 %v793_v1  ;;  %125 = vperm.xlu1 %768, %v44_v4  }
  0x15   :  { %64 = vperm.xlu2 %769, %v46_v6  }
  0x1b   :  { %247 = vperm.xlu0 %764, %v237_v8  }
  0x1c   :  { %770 = vset.pattern.permute.xlu1 %v792_v0 }
  0x1d   :  { %771 = vset.pattern.permute.xlu2 %v794_v7  ;;  %95 = vperm.xlu1 %770, %v46_v6  }
  0x1e   :  { %129 = vperm.xlu2 %771, %v45_v2  }
  0x23   :  { %776 = vset.pattern.permute.xlu0 %v795_v11 }
  0x24   :  { %159 = vperm.xlu0 %776, %v43_v3  }
  0x25   :  { %772 = vset.pattern.permute.xlu1 %v795_v11 }
  0x26   :  { %133 = vperm.xlu2 %771, %v46_v6   ;;  %163 = vperm.xlu1 %772, %v44_v4  }
  0x2c   :  { %375 = vperm.xlu0 %776, %v237_v8  }
  0x2e   :  { %773 = vset.pattern.permute.xlu2 %v795_v11  ;;  %167 = vperm.xlu1 %772, %v45_v2  }
  0x2f   :  { %171 = vperm.xlu2 %773, %v46_v6  }
  0x34   :  { %783 = vset.pattern.permute.xlu0 %v794_v7 }
  0x35   :  { %121 = vperm.xlu0 %783, %v43_v3   ;;  %s748_s8 = spop %747 }
  0x36   :  { %774 = vset.pattern.permute.xlu1 %v793_v1  ;;  %s750_s9 = spop %749  ;;  %v34_v41 = vstv %s748_s8 }
  0x37   :  { %775 = vset.pattern.permute.xlu2 %v793_v1  ;;  %207 = vperm.xlu1 %774, %v873_v12   ;;  %v39_v42 = vstv %s750_s9  ;;  %v36_v44 = vmul.f32 %v743_v40, %v34_v41 }
  0x38   :  { %212 = vperm.xlu2 %775, %v878_v13   ;;  %v41_v45 = vmul.f32 %v39_v42, %v31_v17 }
  0x3a   :  { %v42_v47 = vadd.f32 %v41_v45, %v36_v44 }
  0x3c   :  { %v68_v50 = vperm.slane %v42_v47, 0  ;;  %v69_v51 = vperm.slane %v42_v47, 4  ;;  %v98_v52 = vperm.slane %v42_v47, 1  ;;  %v99_v53 = vperm.slane %v42_v47, 5 }
  0x3d   :  { %329 = vperm.xlu0 %783, %v236_v14   ;;  %v136_v54 = vperm.slane %v42_v47, 2  ;;  %v137_v55 = vperm.slane %v42_v47, 6  ;;  %v174_v63 = vperm.slane %v42_v47, 3 }
  0x3e   :  { %v72_v57 = vperm.slane %v68_v50, 0  ;;  %v73_v58 = vperm.slane %v69_v51, 0  ;;  %v102_v59 = vperm.slane %v98_v52, 1  ;;  %v103_v60 = vperm.slane %v99_v53, 1 }
  0x3f   :  { %217 = vperm.xlu1 %774, %v890_v15   ;;  %v140_v61 = vperm.slane %v136_v54, 2  ;;  %v141_v62 = vperm.slane %v137_v55, 2 }
  0x40   :  { %242 = vperm.xlu2 %775, %v236_v14  }
  0x45   :  { %341 = vperm.xlu0 %783, %v239_v16  }
  0x47   :  { %777 = vset.pattern.permute.xlu1 %v792_v0 }
  0x48   :  { %778 = vset.pattern.permute.xlu2 %v792_v0  ;;  %287 = vperm.xlu1 %777, %v236_v14  }
  0x49   :  { %291 = vperm.xlu2 %778, %v237_v8  }
  0x4d   :  { %791 = vset.pattern.permute.xlu0 %v792_v0 }
  0x50   :  { %779 = vset.pattern.permute.xlu1 %v794_v7 }
  0x51   :  { %780 = vset.pattern.permute.xlu2 %v793_v1  ;;  %333 = vperm.xlu1 %779, %v237_v8  }
  0x52   :  { %252 = vperm.xlu2 %780, %v238_v18  }
  0x59   :  { %781 = vset.pattern.permute.xlu1 %v792_v0 }
  0x5a   :  { %782 = vset.pattern.permute.xlu2 %v795_v11  ;;  %295 = vperm.xlu1 %781, %v238_v18  }
  0x5b   :  { %371 = vperm.xlu2 %782, %v236_v14  }
  0x5c   :  { %v908_v19 = vpop.permute.xlu2 %59 }
  0x5d   :  { %v78_v10 = vmul.f32 %v72_v57, %v908_v19 }
  0x62   :  { %784 = vset.pattern.permute.xlu1 %v794_v7 }
  0x63   :  { %785 = vset.pattern.permute.xlu2 %v793_v1  ;;  %337 = vperm.xlu1 %784, %v238_v18  }
  0x64   :  { %257 = vperm.xlu2 %785, %v239_v16  }
  0x66   :  { %v911_v20 = vpop.permute.xlu2 %91 }
  0x67   :  { %v108_v14 = vmul.f32 %v102_v59, %v911_v20 }
  0x69   :  { %v116_v52 = vadd.f32 %v108_v14, %v78_v10 }
  0x6b   :  { %786 = vset.pattern.permute.xlu1 %v792_v0 }
  0x6c   :  { %787 = vset.pattern.permute.xlu2 %v795_v11  ;;  %299 = vperm.xlu1 %786, %v239_v16  }
  0x6d   :  { %379 = vperm.xlu2 %787, %v238_v18  }
  0x6f   :  { %v916_v22 = vpop.permute.xlu2 %64 }
  0x74   :  { %788 = vset.pattern.permute.xlu1 %v795_v11  ;;  %v79_v11 = vmul.f32 %v73_v58, %v908_v19 }
  0x75   :  { %v913_v21 = vpop.permute.xlu1 %83  ;;  %383 = vperm.xlu1 %788, %v239_v16   ;;  %789 = vset.pattern.permute.xlu2 %v793_v1  ;;  %v923_v25 = vpop.permute.xlu0 %49  ;;  %v109_v16 = vmul.f32 %v103_v60, %v911_v20 }
  0x76   :  { %424 = vperm.xlu2 %789, %v421_v23   ;;  %v104_v2 = vmul.f32 %v102_v59, %v913_v21  ;;  %v105_v3 = vmul.f32 %v103_v60, %v913_v21  ;;  %v74_v4 = vmul.f32 %v72_v57, %v923_v25  ;;  %v75_v6 = vmul.f32 %v73_v58, %v923_v25 }
  0x77   :  { %v178_v23 = vperm.slane %v174_v63, 3  ;;  %v117_v53 = vadd.f32 %v109_v16, %v79_v11 }
  0x78   :  { %v925_v26 = vpop.permute.xlu2 %129  ;;  %v112_v17 = vadd.f32 %v104_v2, %v74_v4  ;;  %v113_v18 = vadd.f32 %v105_v3, %v75_v6  ;;  %v80_v2 = vmul.f32 %v72_v57, %v916_v22  ;;  %v81_v3 = vmul.f32 %v73_v58, %v916_v22 }
  0x79   :  { %v146_v14 = vmul.f32 %v140_v61, %v925_v26 }
  0x7d   :  { %v921_v24 = vpop.permute.xlu1 %87  ;;  %v930_v28 = vpop.permute.xlu0 %54 }
  0x7e   :  { %1237 = vst [vmem:[#allocation2_spill] sm:$0xff] %v921_v24  ;;  %790 = vset.pattern.permute.xlu2 %v792_v0  ;;  %v175_v0 = vperm.slane %v42_v47, 7  ;;  %v106_v38 = vmul.f32 %v102_v59, %v921_v24  ;;  %v107_v40 = vmul.f32 %v103_v60, %v921_v24  ;;  %v76_v41 = vmul.f32 %v72_v57, %v930_v28 }
  0x7f   :  { %v77_v42 = vmul.f32 %v73_v58, %v930_v28 }
  0x80   :  { %v932_v29 = vpop.permute.xlu2 %133  ;;  %v179_v35 = vperm.slane %v175_v0, 3  ;;  %v114_v4 = vadd.f32 %v106_v38, %v76_v41 }
  0x81   :  { %v115_v6 = vadd.f32 %v107_v40, %v77_v42  ;;  %v149_v57 = vmul.f32 %v141_v62, %v932_v29 }
  0x85   :  { %v936_v31 = vpop.permute.xlu0 %202 }
  0x86   :  { %v928_v27 = vpop.permute.xlu1 %125 }
  0x87   :  { %v144_v54 = vmul.f32 %v140_v61, %v928_v27  ;;  %v145_v55 = vmul.f32 %v141_v62, %v928_v27 }
  0x89   :  { %v938_v32 = vpop.permute.xlu2 %171  ;;  %v152_v16 = vadd.f32 %v144_v54, %v114_v4  ;;  %v153_v58 = vadd.f32 %v145_v55, %v115_v6 }
  0x8d   :  { %v942_v34 = vpop.permute.xlu0 %247 }
  0x8e   :  { %1238 = vst [vmem:[#allocation3_spill] sm:$0xff] %v942_v34 }
  0x8f   :  { %v934_v30 = vpop.permute.xlu1 %95 }
  0x90   :  { %v110_v63 = vmul.f32 %v102_v59, %v934_v30  ;;  %v111_v0 = vmul.f32 %v103_v60, %v934_v30  ;;  %v147_v59 = vmul.f32 %v141_v62, %v925_v26  ;;  %v148_v60 = vmul.f32 %v140_v61, %v932_v29 }
  0x92   :  { %v949_v37 = vpop.permute.xlu2 %212 }
  0x96   :  { %v951_v39 = vpop.permute.xlu0 %159 }
  0x97   :  { %v180_v45 = vmul.f32 %v178_v23, %v951_v39  ;;  %v181_v47 = vmul.f32 %v179_v35, %v951_v39 }
  0x98   :  { %v940_v33 = vpop.permute.xlu1 %163 }
  0x99   :  { %v182_v10 = vmul.f32 %v178_v23, %v940_v33  ;;  %v183_v11 = vmul.f32 %v179_v35, %v940_v33 }
  0x9a   :  { %v955_v46 = vpop.permute.xlu2 %242 }
  0x9e   :  { %v957_v48 = vpop.permute.xlu0 %375 }
  0xa0   :  { %v947_v36 = vpop.permute.xlu1 %167 }
  0xa1   :  { %v184_v38 = vmul.f32 %v178_v23, %v947_v36  ;;  %v185_v40 = vmul.f32 %v179_v35, %v947_v36 }
  0xa3   :  { %v961_v56 = vpop.permute.xlu2 %291 }
  0xa4   :  { %1239 = vst [vmem:[#allocation4_spill] sm:$0xff] %v961_v56 }
  0xa7   :  { %v963_v1 = vpop.permute.xlu0 %121 }
  0xa8   :  { %v142_v8 = vmul.f32 %v140_v61, %v963_v1  ;;  %v143_v9 = vmul.f32 %v141_v62, %v963_v1  ;;  %v186_v61 = vmul.f32 %v178_v23, %v938_v32  ;;  %v187_v62 = vmul.f32 %v179_v35, %v938_v32 }
  0xa9   :  { %v953_v43 = vpop.permute.xlu1 %207 }
  0xaa   :  { %v150_v50 = vadd.f32 %v142_v8, %v112_v17  ;;  %v151_v51 = vadd.f32 %v143_v9, %v113_v18  ;;  %v118_v17 = vadd.f32 %v110_v63, %v80_v2  ;;  %v119_v18 = vadd.f32 %v111_v0, %v81_v3 }
  0xac   :  { %v981_v44 = vpop.permute.xlu2 %252  ;;  %v188_v8 = vadd.f32 %v180_v45, %v150_v50  ;;  %v189_v9 = vadd.f32 %v181_v47, %v151_v51  ;;  %v190_v45 = vadd.f32 %v182_v10, %v152_v16  ;;  %v191_v47 = vadd.f32 %v183_v11, %v153_v58 }
  0xad   :  { %v154_v50 = vadd.f32 %v146_v14, %v116_v52  ;;  %v155_v51 = vadd.f32 %v147_v59, %v117_v53  ;;  %v156_v0 = vadd.f32 %v148_v60, %v118_v17  ;;  %v157_v2 = vadd.f32 %v149_v57, %v119_v18 }
  0xae   :  { %v220_v41 = vadd.f32 %v936_v31, %v188_v8  ;;  %v221_v42 = vadd.f32 %v936_v31, %v189_v9  ;;  %v222_v55 = vadd.f32 %v953_v43, %v190_v45  ;;  %v223_v63 = vadd.f32 %v953_v43, %v191_v47 }
  0xaf   :  { %v192_v3 = vadd.f32 %v184_v38, %v154_v50  ;;  %v193_v4 = vadd.f32 %v185_v40, %v155_v51  ;;  %v1019_v35 = vpop.permute.xlu0 %329  ;;  %v194_v8 = vadd.f32 %v186_v61, %v156_v0  ;;  %v195_v9 = vadd.f32 %v187_v62, %v157_v2 }
  0xb0   :  { %v1009_v6 = vmax.f32 %v220_v41, 0.0  ;;  %v1011_v31 = vmax.f32 %v221_v42, 0.0  ;;  %v1015_v53 = vmax.f32 %v222_v55, 0.0  ;;  %v1017_v23 = vmax.f32 %v223_v63, 0.0 }
  0xb1   :  { %v959_v49 = vpop.permute.xlu1 %217  ;;  %v224_v43 = vadd.f32 %v949_v37, %v192_v3  ;;  %v225_v10 = vadd.f32 %v949_v37, %v193_v4 }
  0xb2   :  { %v260_v11 = vmul.f32 %v955_v46, %v1009_v6  ;;  %v261_v14 = vmul.f32 %v955_v46, %v1011_v31  ;;  %v226_v59 = vadd.f32 %v959_v49, %v194_v8  ;;  %v227_v60 = vadd.f32 %v959_v49, %v195_v9 }
  0xb3   :  { %v262_v57 = vmul.f32 %v942_v34, %v1015_v53  ;;  %v263_v16 = vmul.f32 %v942_v34, %v1017_v23  ;;  %v1033_v58 = vmax.f32 %v224_v43, 0.0  ;;  %v1035_v17 = vmax.f32 %v225_v10, 0.0 }
  0xb4   :  { %v1043_v41 = vmax.f32 %v226_v59, 0.0  ;;  %v1045_v42 = vmax.f32 %v227_v60, 0.0  ;;  %v344_v50 = vmul.f32 %v1019_v35, %v1009_v6  ;;  %v345_v51 = vmul.f32 %v1019_v35, %v1011_v31 }
  0xb5   :  { %v1005_v54 = vpop.permute.xlu2 %371  ;;  %v268_v40 = vadd.f32 %v262_v57, %v260_v11  ;;  %v277_v49 = vadd.f32 %v263_v16, %v261_v14  ;;  %v264_v45 = vmul.f32 %v981_v44, %v1033_v58  ;;  %v265_v47 = vmul.f32 %v981_v44, %v1035_v17 }
  0xb6   :  { %v304_v59 = vmul.f32 %v961_v56, %v1015_v53  ;;  %v305_v60 = vmul.f32 %v961_v56, %v1017_v23 }
  0xb7   :  { %v269_v4 = vadd.f32 %v268_v40, %v264_v45  ;;  %v278_v8 = vadd.f32 %v277_v49, %v265_v47  ;;  %v1065_v9 = vpop.permute.xlu0 %341 }
  0xba   :  { %v969_v7 = vpop.permute.xlu1 %287 }
  0xbb   :  { %v302_v43 = vmul.f32 %v969_v7, %v1009_v6  ;;  %v303_v10 = vmul.f32 %v969_v7, %v1011_v31 }
  0xbd   :  { %v310_v45 = vadd.f32 %v304_v59, %v302_v43  ;;  %v319_v47 = vadd.f32 %v305_v60, %v303_v10 }
  0xbe   :  { %v1037_v37 = vpop.permute.xlu2 %257 }
  0xbf   :  { %v266_v62 = vmul.f32 %v1037_v37, %v1043_v41  ;;  %v267_v55 = vmul.f32 %v1037_v37, %v1045_v42 }
  0xc1   :  { %v270_v57 = vadd.f32 %v269_v4, %v266_v62  ;;  %v279_v16 = vadd.f32 %v278_v8, %v267_v55 }
  0xc3   :  { %v991_v24 = vpop.permute.xlu1 %333 }
  0xc4   :  { %1240 = vst [vmem:[#allocation5_spill] sm:$0xff] %v991_v24  ;;  %v346_v18 = vmul.f32 %v991_v24, %v1015_v53  ;;  %v347_v38 = vmul.f32 %v991_v24, %v1017_v23 }
  0xc6   :  { %v352_v2 = vadd.f32 %v346_v18, %v344_v50  ;;  %v361_v3 = vadd.f32 %v347_v38, %v345_v51  ;;  %v350_v18 = vmul.f32 %v1065_v9, %v1043_v41  ;;  %v351_v38 = vmul.f32 %v1065_v9, %v1045_v42 }
  0xc7   :  { %v1089_v8 = vpop.permute.xlu2 %379 }
  0xcc   :  { %v1013_v52 = vpop.permute.xlu1 %295 }
  0xcd   :  { %v306_v40 = vmul.f32 %v1013_v52, %v1033_v58  ;;  %v307_v49 = vmul.f32 %v1013_v52, %v1035_v17 }
  0xcf   :  { %v311_v55 = vadd.f32 %v310_v45, %v306_v40 }
  0xd5   :  { %v1055_v61 = vpop.permute.xlu1 %337 }
  0xd6   :  { %v348_v63 = vmul.f32 %v1055_v61, %v1033_v58  ;;  %v349_v0 = vmul.f32 %v1055_v61, %v1035_v17 }
  0xd8   :  { %v353_v11 = vadd.f32 %v352_v2, %v348_v63  ;;  %v362_v14 = vadd.f32 %v361_v3, %v349_v0  ;;  %v271_v63 = vrot.slane %v270_v57, 4  ;;  %v280_v0 = vrot.slane %v279_v16, 4 }
  0xd9   :  { %v320_v2 = vadd.f32 %v319_v47, %v307_v49 }
  0xda   :  { %v354_v50 = vadd.f32 %v353_v11, %v350_v18  ;;  %v363_v51 = vadd.f32 %v362_v14, %v351_v38  ;;  %v386_v11 = vmul.f32 %v1005_v54, %v1009_v6  ;;  %v387_v14 = vmul.f32 %v1005_v54, %v1011_v31  ;;  %v454_v18 = vld [vmem:[%s1224_s0 + $0x1] sm:$0x1]  ;;  %v453_v38 = vld [vmem:[%s1224_s0] sm:$0x1] }
  0xdb   :  { %v272_v59 = vadd.f32 %v271_v63, %v270_v57  ;;  %v281_v60 = vadd.f32 %v280_v0, %v279_v16  ;;  %469 = vrot.lane.b32.xlu0 %v454_v18, %s796_s14  ;;  %462 = vrot.lane.b32.xlu2 %v453_v38, %s796_s14  ;;  %v388_v6 = vmul.f32 %v957_v48, %v1015_v53 }
  0xdc   :  { %v355_v24 = vrot.slane %v354_v50, 4  ;;  %v364_v56 = vrot.slane %v363_v51, 4  ;;  %v389_v31 = vmul.f32 %v957_v48, %v1017_v23  ;;  %v390_v57 = vmul.f32 %v1089_v8, %v1033_v58 }
  0xdd   :  { %v391_v16 = vmul.f32 %v1089_v8, %v1035_v17 }
  0xde   :  { %v1083_v62 = vpop.permute.xlu1 %299  ;;  %v356_v45 = vadd.f32 %v355_v24, %v354_v50  ;;  %v365_v47 = vadd.f32 %v364_v56, %v363_v51 }
  0xdf   :  { %v308_v3 = vmul.f32 %v1083_v62, %v1043_v41  ;;  %v309_v4 = vmul.f32 %v1083_v62, %v1045_v42 }
  0xe0   :  { %v357_v24 = vrot.slane %v356_v45, 2  ;;  %v366_v56 = vrot.slane %v365_v47, 2 }
  0xe1   :  { %v312_v43 = vadd.f32 %v311_v55, %v308_v3  ;;  %v321_v10 = vadd.f32 %v320_v2, %v309_v4  ;;  %v394_v55 = vadd.f32 %v388_v6, %v386_v11  ;;  %v403_v2 = vadd.f32 %v389_v31, %v387_v14 }
  0xe2   :  { %v273_v3 = vrot.slane %v272_v59, 2  ;;  %v282_v4 = vrot.slane %v281_v60, 2 }
  0xe3   :  { %v313_v40 = vrot.slane %v312_v43, 4  ;;  %v322_v49 = vrot.slane %v321_v10, 4  ;;  %v395_v34 = vadd.f32 %v394_v55, %v390_v57  ;;  %v404_v23 = vadd.f32 %v403_v2, %v391_v16  ;;  %563 = vperm.xlu2 %790, %v853_v5   ;;  %568 = vperm.xlu0 %791, %v873_v12  }
  0xe4   :  { %v367_v57 = vadd.f32 %v366_v56, %v365_v47 }
  0xe5   :  { %v314_v63 = vadd.f32 %v313_v40, %v312_v43  ;;  %v323_v0 = vadd.f32 %v322_v49, %v321_v10  ;;  %v274_v43 = vadd.f32 %v273_v3, %v272_v59  ;;  %v283_v10 = vadd.f32 %v282_v4, %v281_v60 }
  0xe6   :  { %v368_v3 = vrot.slane %v367_v57, 1 }
  0xe7   :  { %v315_v18 = vrot.slane %v314_v63, 2  ;;  %v324_v38 = vrot.slane %v323_v0, 2  ;;  %v1109_v53 = vpop.permute.xlu1 %383  ;;  %v275_v16 = vrot.slane %v274_v43, 1 }
  0xe8   :  { %v392_v58 = vmul.f32 %v1109_v53, %v1043_v41  ;;  %v393_v17 = vmul.f32 %v1109_v53, %v1045_v42  ;;  %v358_v41 = vadd.f32 %v357_v24, %v356_v45  ;;  %v284_v42 = vrot.slane %v283_v10, 1  ;;  %v1120_v24 = vpop.permute.xlu2 %424 }
  0xe9   :  { %v316_v50 = vadd.f32 %v315_v18, %v314_v63  ;;  %v325_v51 = vadd.f32 %v324_v38, %v323_v0  ;;  %v276_v5 = vadd.f32 %v275_v16, %v274_v43 }
  0xea   :  { %v396_v11 = vadd.f32 %v395_v34, %v392_v58  ;;  %v405_v14 = vadd.f32 %v404_v23, %v393_v17  ;;  %v359_v34 = vrot.slane %v358_v41, 1  ;;  %v285_v4 = vadd.f32 %v284_v42, %v283_v10 }
  0xeb   :  { %v317_v40 = vrot.slane %v316_v50, 1  ;;  %v326_v49 = vrot.slane %v325_v51, 1  ;;  %573 = vperm.xlu2 %790, %v878_v13   ;;  %v369_v17 = vadd.f32 %v368_v3, %v367_v57 }
  0xec   :  { %v397_v6 = vrot.slane %v396_v11, 4  ;;  %v406_v31 = vrot.slane %v405_v14, 4  ;;  %v360_v58 = vadd.f32 %v359_v34, %v358_v41 }
  0xed   :  { %v318_v63 = vadd.f32 %v317_v40, %v316_v50  ;;  %v327_v0 = vadd.f32 %v326_v49, %v325_v51 }
  0xee   :  { %v398_v55 = vadd.f32 %v397_v6, %v396_v11  ;;  %v407_v2 = vadd.f32 %v406_v31, %v405_v14  ;;  %v431_v11 = vld.sshfl [vmem:[#allocation1] sm:$0xff pattern:$0x75316420]  ;;  %v432_v14 = vld.sshfl [vmem:[#allocation1 + $0x8] sm:$0xff pattern:$0x75316420] }
  0xef   :  { %v413_v38 = vsel %vm412_vm0, %v276_v5, %v318_v63  ;;  %v414_v23 = vsel %vm412_vm0, %v285_v4, %v327_v0 }
  0xf0   :  { %v399_v59 = vrot.slane %v398_v55, 2  ;;  %v408_v60 = vrot.slane %v407_v2, 2  ;;  %v416_v51 = vsel %vm415_vm1, %v413_v38, %v360_v58  ;;  %v417_v43 = vsel %vm415_vm1, %v414_v23, %v369_v17 }
  0xf2   :  { %v400_v12 = vadd.f32 %v399_v59, %v398_v55  ;;  %v409_v18 = vadd.f32 %v408_v60, %v407_v2 }
  0xf3   :  { %578 = vperm.xlu2 %790, %v890_v15   ;;  %v746_v15 = vld [vmem:[%s1225_s2 + $0x8] sm:$0xff] }
  0xf4   :  { %v401_v45 = vrot.slane %v400_v12, 1  ;;  %v410_v47 = vrot.slane %v409_v18, 1  ;;  %710 = vst [vmem:[#allocation1] ss:$2 sm:$0xff] %v746_v15 }
  0xf6   :  { %v402_v56 = vadd.f32 %v401_v45, %v400_v12  ;;  %v411_v50 = vadd.f32 %v410_v47, %v409_v18  ;;  %v744_v12 = vld [vmem:[%s1227_s1 + $0x8] sm:$0xff] }
  0xf7   :  { %v457_v18 = vmul.f32 2.0, %v744_v12 }
  0xf8   :  { %v419_v10 = vsel %vm418_vm2, %v416_v51, %v402_v56  ;;  %v420_v13 = vsel %vm418_vm2, %v417_v43, %v411_v50 }
  0xf9   :  { %v427_v40 = vadd.f32 %v1120_v24, %v419_v10  ;;  %v428_v49 = vadd.f32 %v1120_v24, %v420_v13  ;;  %v745_v45 = vadd.f32 -1.0, %v457_v18 }
  0xfb   :  { %v435_v6 = vsub.f32 %v427_v40, %v431_v11  ;;  %v436_v31 = vsub.f32 %v428_v49, %v432_v14 }
  0xfd   :  { %v437_v41 = vand.u32 2147483647, %v435_v6  ;;  %v438_v57 = vand.u32 2147483647, %v436_v31 }
  0xff   :  { %v440_v16 = vsel %vm439_vm3, %v437_v41, 0.0  ;;  %v441_v42 = vsel %vm439_vm3, %v438_v57, 0.0 }
 0x100   :  { %v442_v55 = vadd.f32 %v441_v42, %v440_v16 }
 0x102   :  { %443 = vadd.xlane.f32.xlu1 %v442_v55 }
 0x135   :  { %v463_v3 = vpop.permute.xlu2 %462 }
 0x13d   :  { %v1139_v38 = vpop.permute.xlu2 %563 }
 0x14d   :  { %v470_v4 = vpop.permute.xlu0 %469 }
 0x175   :  { %v444_v2 = vpop.xlane.xlu1 %443 }
 0x176   :  { %v445_v63 = vrot.slane %v444_v2, 4 }
 0x178   :  { %v446_v0 = vadd.f32 %v445_v63, %v444_v2 }
 0x17a   :  { %v447_v59 = vrot.slane %v446_v0, 2 }
 0x17c   :  { %v448_v60 = vadd.f32 %v447_v59, %v446_v0 }
 0x17e   :  { %v449_v34 = vrot.slane %v448_v60, 1 }
 0x180   :  { %v450_v5 = vadd.f32 %v449_v34, %v448_v60  ;;  %v574_v60 = vpop.permute.xlu2 %573 }
 0x182   :  { %751 = vpush %v450_v5 }
 0x183   :  { %753 = vpush %v463_v3 }
 0x184   :  { %755 = vpush %v470_v4 }
 0x1b3   :  { %s1137_s17 = spop %751 }
 0x1b4   :  { %s754_s18 = spop %753 }
 0x1b5   :  { %v465_v47 = vstv %s754_s18  ;;  %s756_s19 = spop %755 }
 0x1b6   :  { %v467_v23 = vmul.f32 %v745_v45, %v465_v47  ;;  %v472_v58 = vstv %s756_s19 }
 0x1b7   :  { %v474_v17 = vmul.f32 %v746_v15, %v472_v58 }
 0x1b9   :  { %v475_v56 = vadd.f32 %v474_v17, %v467_v23 }
 0x1bb   :  { %v477_v50 = vperm.slane %v475_v56, 0  ;;  %v478_v51 = vperm.slane %v475_v56, 4  ;;  %v491_v43 = vperm.slane %v475_v56, 1  ;;  %v492_v10 = vperm.slane %v475_v56, 5 }
 0x1bc   :  { %v513_v13 = vperm.slane %v475_v56, 2  ;;  %v514_v11 = vperm.slane %v475_v56, 6  ;;  %v535_v14 = vperm.slane %v475_v56, 3  ;;  %v536_v40 = vperm.slane %v475_v56, 7 }
 0x1bd   :  { %v481_v49 = vperm.slane %v477_v50, 0  ;;  %v482_v6 = vperm.slane %v478_v51, 0  ;;  %v495_v31 = vperm.slane %v491_v43, 1  ;;  %v496_v41 = vperm.slane %v492_v10, 1 }
 0x1be   :  { %v517_v57 = vperm.slane %v513_v13, 2  ;;  %v518_v16 = vperm.slane %v514_v11, 2  ;;  %v539_v42 = vperm.slane %v535_v14, 3  ;;  %v540_v55 = vperm.slane %v536_v40, 3 }
 0x1bf   :  { %v483_v2 = vmul.f32 %v481_v49, %v923_v25  ;;  %v484_v63 = vmul.f32 %v482_v6, %v923_v25  ;;  %v487_v0 = vmul.f32 %v481_v49, %v908_v19  ;;  %v488_v59 = vmul.f32 %v482_v6, %v908_v19 }
 0x1c0   :  { %v489_v34 = vmul.f32 %v481_v49, %v916_v22  ;;  %v490_v3 = vmul.f32 %v482_v6, %v916_v22  ;;  %v497_v5 = vmul.f32 %v495_v31, %v913_v21  ;;  %v498_v4 = vmul.f32 %v496_v41, %v913_v21 }
 0x1c1   :  { %v501_v15 = vmul.f32 %v495_v31, %v911_v20  ;;  %v502_v12 = vmul.f32 %v496_v41, %v911_v20  ;;  %v503_v18 = vmul.f32 %v495_v31, %v934_v30  ;;  %v504_v25 = vmul.f32 %v496_v41, %v934_v30 }
 0x1c2   :  { %v505_v45 = vadd.f32 %v497_v5, %v483_v2  ;;  %v506_v47 = vadd.f32 %v498_v4, %v484_v63  ;;  %v519_v19 = vmul.f32 %v517_v57, %v963_v1  ;;  %v520_v23 = vmul.f32 %v518_v16, %v963_v1 }
 0x1c3   :  { %v509_v58 = vadd.f32 %v501_v15, %v487_v0  ;;  %v510_v22 = vadd.f32 %v502_v12, %v488_v59  ;;  %v511_v17 = vadd.f32 %v503_v18, %v489_v34  ;;  %v512_v56 = vadd.f32 %v504_v25, %v490_v3  ;;  %v579_v12 = vpop.permute.xlu2 %578  ;;  %v1241_v18 = vld [vmem:[#allocation2_spill] sm:$0xff] }
 0x1c4   :  { %v523_v21 = vmul.f32 %v517_v57, %v925_v26  ;;  %v524_v50 = vmul.f32 %v518_v16, %v925_v26  ;;  %v525_v20 = vmul.f32 %v517_v57, %v932_v29  ;;  %v526_v51 = vmul.f32 %v518_v16, %v932_v29 }
 0x1c5   :  { %v527_v43 = vadd.f32 %v519_v19, %v505_v45  ;;  %v528_v30 = vadd.f32 %v520_v23, %v506_v47  ;;  %v541_v10 = vmul.f32 %v539_v42, %v951_v39  ;;  %v542_v13 = vmul.f32 %v540_v55, %v951_v39 }
 0x1c6   :  { %v531_v11 = vadd.f32 %v523_v21, %v509_v58  ;;  %v532_v1 = vadd.f32 %v524_v50, %v510_v22  ;;  %v533_v14 = vadd.f32 %v525_v20, %v511_v17  ;;  %v534_v40 = vadd.f32 %v526_v51, %v512_v56 }
 0x1c7   :  { %v545_v2 = vmul.f32 %v539_v42, %v947_v36  ;;  %v546_v63 = vmul.f32 %v540_v55, %v947_v36  ;;  %v547_v26 = vmul.f32 %v539_v42, %v938_v32  ;;  %v548_v0 = vmul.f32 %v540_v55, %v938_v32 }
 0x1c8   :  { %v549_v59 = vadd.f32 %v541_v10, %v527_v43  ;;  %v550_v29 = vadd.f32 %v542_v13, %v528_v30  ;;  %v485_v34 = vmul.f32 %v481_v49, %v930_v28  ;;  %v486_v3 = vmul.f32 %v482_v6, %v930_v28  ;;  %v569_v43 = vpop.permute.xlu0 %568 }
 0x1c9   :  { %v553_v5 = vadd.f32 %v545_v2, %v531_v11  ;;  %v554_v39 = vadd.f32 %v546_v63, %v532_v1  ;;  %v555_v4 = vadd.f32 %v547_v26, %v533_v14  ;;  %v556_v15 = vadd.f32 %v548_v0, %v534_v40 }
 0x1ca   :  { %v499_v25 = vmul.f32 %v495_v31, %v1241_v18  ;;  %v500_v45 = vmul.f32 %v496_v41, %v1241_v18  ;;  %v521_v36 = vmul.f32 %v517_v57, %v928_v27  ;;  %v522_v47 = vmul.f32 %v518_v16, %v928_v27 }
 0x1cb   :  { %v585_v32 = vadd.f32 %v574_v60, %v553_v5  ;;  %v586_v19 = vadd.f32 %v574_v60, %v554_v39  ;;  %v587_v23 = vadd.f32 %v579_v12, %v555_v4  ;;  %v588_v58 = vadd.f32 %v579_v12, %v556_v15  ;;  %v1242_v4 = vld [vmem:[#allocation3_spill] sm:$0xff]  ;;  %v1243_v12 = vld [vmem:[#allocation4_spill] sm:$0xff] }
 0x1cc   :  { %v507_v49 = vadd.f32 %v499_v25, %v485_v34  ;;  %v508_v22 = vadd.f32 %v500_v45, %v486_v3  ;;  %v543_v28 = vmul.f32 %v539_v42, %v940_v33  ;;  %v544_v6 = vmul.f32 %v540_v55, %v940_v33  ;;  %v1244_v25 = vld [vmem:[#allocation5_spill] sm:$0xff] }
 0x1cd   :  { %v595_v17 = vmax.f32 %v587_v23, 0.0  ;;  %v596_v56 = vmax.f32 %v588_v58, 0.0  ;;  %v581_v31 = vadd.f32 %v1139_v38, %v549_v59  ;;  %v582_v41 = vadd.f32 %v1139_v38, %v550_v29 }
 0x1ce   :  { %v529_v21 = vadd.f32 %v521_v36, %v507_v49  ;;  %v530_v57 = vadd.f32 %v522_v47, %v508_v22  ;;  %v593_v50 = vmax.f32 %v585_v32, 0.0  ;;  %v594_v27 = vmax.f32 %v586_v19, 0.0 }
 0x1cf   :  { %v603_v16 = vmul.f32 %v595_v17, %v1037_v37  ;;  %v604_v60 = vmul.f32 %v596_v56, %v1037_v37  ;;  %v629_v20 = vmul.f32 %v595_v17, %v1083_v62  ;;  %v630_v42 = vmul.f32 %v596_v56, %v1083_v62 }
 0x1d0   :  { %v655_v33 = vmul.f32 %v595_v17, %v1065_v9  ;;  %v656_v55 = vmul.f32 %v596_v56, %v1065_v9  ;;  %v681_v51 = vmul.f32 %v595_v17, %v1109_v53  ;;  %v682_v38 = vmul.f32 %v596_v56, %v1109_v53 }
 0x1d1   :  { %v551_v30 = vadd.f32 %v543_v28, %v529_v21  ;;  %v552_v10 = vadd.f32 %v544_v6, %v530_v57  ;;  %v589_v13 = vmax.f32 %v581_v31, 0.0  ;;  %v590_v11 = vmax.f32 %v582_v41, 0.0 }
 0x1d2   :  { %v601_v1 = vmul.f32 %v593_v50, %v981_v44  ;;  %v602_v37 = vmul.f32 %v594_v27, %v981_v44  ;;  %v627_v14 = vmul.f32 %v593_v50, %v1013_v52  ;;  %v628_v62 = vmul.f32 %v594_v27, %v1013_v52 }
 0x1d3   :  { %v583_v40 = vadd.f32 %v569_v43, %v551_v30  ;;  %v584_v2 = vadd.f32 %v569_v43, %v552_v10  ;;  %v597_v9 = vmul.f32 %v589_v13, %v955_v46  ;;  %v598_v63 = vmul.f32 %v590_v11, %v955_v46 }
 0x1d4   :  { %v623_v53 = vmul.f32 %v589_v13, %v969_v7  ;;  %v624_v26 = vmul.f32 %v590_v11, %v969_v7  ;;  %v649_v0 = vmul.f32 %v589_v13, %v1019_v35  ;;  %v650_v59 = vmul.f32 %v590_v11, %v1019_v35 }
 0x1d5   :  { %v591_v29 = vmax.f32 %v583_v40, 0.0  ;;  %v592_v44 = vmax.f32 %v584_v2, 0.0  ;;  %v653_v34 = vmul.f32 %v593_v50, %v1055_v61  ;;  %v654_v52 = vmul.f32 %v594_v27, %v1055_v61 }
 0x1d6   :  { %v675_v3 = vmul.f32 %v589_v13, %v1005_v54  ;;  %v676_v5 = vmul.f32 %v590_v11, %v1005_v54  ;;  %v679_v46 = vmul.f32 %v593_v50, %v1089_v8  ;;  %v680_v39 = vmul.f32 %v594_v27, %v1089_v8 }
 0x1d7   :  { %v599_v7 = vmul.f32 %v591_v29, %v1242_v4  ;;  %v600_v15 = vmul.f32 %v592_v44, %v1242_v4  ;;  %v625_v35 = vmul.f32 %v591_v29, %v1243_v12  ;;  %v626_v18 = vmul.f32 %v592_v44, %v1243_v12 }
 0x1d8   :  { %v651_v45 = vmul.f32 %v591_v29, %v1244_v25  ;;  %v652_v61 = vmul.f32 %v592_v44, %v1244_v25  ;;  %v677_v36 = vmul.f32 %v591_v29, %v957_v48  ;;  %v678_v54 = vmul.f32 %v592_v44, %v957_v48 }
 0x1d9   :  { %v605_v47 = vadd.f32 %v599_v7, %v597_v9  ;;  %v614_v32 = vadd.f32 %v600_v15, %v598_v63  ;;  %v631_v19 = vadd.f32 %v625_v35, %v623_v53  ;;  %v640_v8 = vadd.f32 %v626_v18, %v624_v26 }
 0x1da   :  { %v657_v23 = vadd.f32 %v651_v45, %v649_v0  ;;  %v666_v58 = vadd.f32 %v652_v61, %v650_v59  ;;  %v683_v49 = vadd.f32 %v677_v36, %v675_v3  ;;  %v692_v22 = vadd.f32 %v678_v54, %v676_v5 }
 0x1db   :  { %v606_v28 = vadd.f32 %v605_v47, %v601_v1  ;;  %v615_v6 = vadd.f32 %v614_v32, %v602_v37  ;;  %v632_v17 = vadd.f32 %v631_v19, %v627_v14  ;;  %v641_v56 = vadd.f32 %v640_v8, %v628_v62 }
 0x1dc   :  { %v658_v31 = vadd.f32 %v657_v23, %v653_v34  ;;  %v667_v41 = vadd.f32 %v666_v58, %v654_v52  ;;  %v684_v21 = vadd.f32 %v683_v49, %v679_v46  ;;  %v693_v57 = vadd.f32 %v692_v22, %v680_v39 }
 0x1dd   :  { %v607_v50 = vadd.f32 %v606_v28, %v603_v16  ;;  %v616_v27 = vadd.f32 %v615_v6, %v604_v60  ;;  %v633_v43 = vadd.f32 %v632_v17, %v629_v20  ;;  %v642_v48 = vadd.f32 %v641_v56, %v630_v42 }
 0x1de   :  { %v659_v30 = vadd.f32 %v658_v31, %v655_v33  ;;  %v668_v10 = vadd.f32 %v667_v41, %v656_v55  ;;  %v685_v13 = vadd.f32 %v684_v21, %v681_v51  ;;  %v694_v11 = vadd.f32 %v693_v57, %v682_v38  ;;  %v711_v57 = vld.sshfl [vmem:[#allocation1] sm:$0xff pattern:$0x75316420] }
 0x1df   :  { %v608_v40 = vrot.slane %v607_v50, 4  ;;  %v617_v2 = vrot.slane %v616_v27, 4  ;;  %v634_v9 = vrot.slane %v633_v43, 4  ;;  %v643_v63 = vrot.slane %v642_v48, 4 }
 0x1e0   :  { %v660_v1 = vrot.slane %v659_v30, 4  ;;  %v669_v37 = vrot.slane %v668_v10, 4  ;;  %v686_v14 = vrot.slane %v685_v13, 4  ;;  %v695_v62 = vrot.slane %v694_v11, 4 }
 0x1e1   :  { %v609_v53 = vadd.f32 %v608_v40, %v607_v50  ;;  %v618_v26 = vadd.f32 %v617_v2, %v616_v27  ;;  %v635_v0 = vadd.f32 %v634_v9, %v633_v43  ;;  %v644_v59 = vadd.f32 %v643_v63, %v642_v48  ;;  %v712_v50 = vld.sshfl [vmem:[#allocation1 + $0x8] sm:$0xff pattern:$0x75316420] }
 0x1e2   :  { %v661_v16 = vadd.f32 %v660_v1, %v659_v30  ;;  %v670_v60 = vadd.f32 %v669_v37, %v668_v10  ;;  %v687_v20 = vadd.f32 %v686_v14, %v685_v13  ;;  %v696_v42 = vadd.f32 %v695_v62, %v694_v11 }
 0x1e3   :  { %v610_v33 = vrot.slane %v609_v53, 2  ;;  %v619_v55 = vrot.slane %v618_v26, 2  ;;  %v636_v51 = vrot.slane %v635_v0, 2  ;;  %v645_v38 = vrot.slane %v644_v59, 2 }
 0x1e4   :  { %v662_v29 = vrot.slane %v661_v16, 2  ;;  %v671_v44 = vrot.slane %v670_v60, 2  ;;  %v688_v34 = vrot.slane %v687_v20, 2  ;;  %v697_v52 = vrot.slane %v696_v42, 2 }
 0x1e5   :  { %v611_v3 = vadd.f32 %v610_v33, %v609_v53  ;;  %v620_v5 = vadd.f32 %v619_v55, %v618_v26  ;;  %v637_v46 = vadd.f32 %v636_v51, %v635_v0  ;;  %v646_v39 = vadd.f32 %v645_v38, %v644_v59 }
 0x1e6   :  { %v663_v4 = vadd.f32 %v662_v29, %v661_v16  ;;  %v672_v7 = vadd.f32 %v671_v44, %v670_v60  ;;  %v689_v15 = vadd.f32 %v688_v34, %v687_v20  ;;  %v698_v12 = vadd.f32 %v697_v52, %v696_v42 }
 0x1e7   :  { %v612_v35 = vrot.slane %v611_v3, 1  ;;  %v621_v18 = vrot.slane %v620_v5, 1  ;;  %v638_v25 = vrot.slane %v637_v46, 1  ;;  %v647_v45 = vrot.slane %v646_v39, 1 }
 0x1e8   :  { %v664_v61 = vrot.slane %v663_v4, 1  ;;  %v673_v36 = vrot.slane %v672_v7, 1  ;;  %v690_v54 = vrot.slane %v689_v15, 1  ;;  %v699_v47 = vrot.slane %v698_v12, 1 }
 0x1e9   :  { %v613_v32 = vadd.f32 %v612_v35, %v611_v3  ;;  %v622_v19 = vadd.f32 %v621_v18, %v620_v5  ;;  %v639_v8 = vadd.f32 %v638_v25, %v637_v46  ;;  %v648_v23 = vadd.f32 %v647_v45, %v646_v39 }
 0x1ea   :  { %v665_v58 = vadd.f32 %v664_v61, %v663_v4  ;;  %v674_v49 = vadd.f32 %v673_v36, %v672_v7  ;;  %v691_v22 = vadd.f32 %v690_v54, %v689_v15  ;;  %v700_v28 = vadd.f32 %v699_v47, %v698_v12 }
 0x1eb   :  { %v701_v6 = vsel %vm412_vm0, %v613_v32, %v639_v8  ;;  %v702_v17 = vsel %vm412_vm0, %v622_v19, %v648_v23 }
 0x1ec   :  { %v703_v56 = vsel %vm415_vm1, %v701_v6, %v665_v58  ;;  %v704_v31 = vsel %vm415_vm1, %v702_v17, %v674_v49 }
 0x1ed   :  { %v705_v41 = vsel %vm418_vm2, %v703_v56, %v691_v22  ;;  %v706_v21 = vsel %vm418_vm2, %v704_v31, %v700_v28 }
 0x1ee   :  { %v707_v27 = vadd.f32 %v705_v41, %v1120_v24  ;;  %v708_v43 = vadd.f32 %v706_v21, %v1120_v24  ;;  %v732_v24 = vlaneseq }
 0x1f0   :  { %v715_v48 = vsub.f32 %v707_v27, %v711_v57  ;;  %v716_v30 = vsub.f32 %v708_v43, %v712_v50  ;;  %v733_v26 = vand.u32 127, %v732_v24 }
 0x1f2   :  { %v717_v10 = vand.u32 2147483647, %v715_v48  ;;  %v718_v13 = vand.u32 2147483647, %v716_v30  ;;  %vm734_vm4 = vcmp.eq.s32.totalorder %v733_v26, 0 }
 0x1f4   :  { %v719_v11 = vsel %vm439_vm3, %v717_v10, 0.0  ;;  %v720_v40 = vsel %vm439_vm3, %v718_v13, 0.0 }
 0x1f5   :  { %v721_v2 = vadd.f32 %v720_v40, %v719_v11 }
 0x1f7   :  { %722 = vadd.xlane.f32.xlu0 %v721_v2 }
 0x26a   :  { %v723_v9 = vpop.xlane.xlu0 %722 }
 0x26b   :  { %v724_v63 = vrot.slane %v723_v9, 4 }
 0x26d   :  { %v725_v1 = vadd.f32 %v724_v63, %v723_v9 }
 0x26f   :  { %v726_v37 = vrot.slane %v725_v1, 2 }
 0x271   :  { %v727_v14 = vadd.f32 %v726_v37, %v725_v1 }
 0x273   :  { %v728_v62 = vrot.slane %v727_v14, 1 }
 0x275   :  { %v729_v53 = vadd.f32 %v728_v62, %v727_v14 }
 0x277   :  { %757 = vpush %v729_v53 }
 0x2a8   :  { %s758_s1 = spop %757 }
 0x2a9   :  { %s731_s2 = sadd.f32 %s758_s1, %s1137_s17 }
 0x2ab   :  { %s735_s20 = smul.f32 0.00048828125, %s731_s2 }
 0x2ad   :  { %v736_v0 = vstv %s735_s20 }
 0x2ae   :  { %v737_v59 = vsel %vm734_vm4, %v736_v0, 0.0 }
 0x2af   :  { %738 = vst [vmem:[%s1228_s7] sm:$0x1] %v737_v59 }

</bundles_post_ra>
